<compile_context>
chip_gen: v7x
topology: tpu7x:2x2x1
jax: 0.10.0
libtpu: 0.0.40
codegen_flags: <defaults>
</compile_context>

<pallas_src>
import math
import functools

import jax
import jax.numpy as jnp
import numpy as np
from jax.experimental import pallas as pl
from jax.experimental.pallas import tpu as pltpu

B_CLASS, E_CLASS, C_CLASS, O_CLASS = 0, 1, 2, 3


def beco_tagger_kernel(reps_ref,     # (1, TILE_T, H) bf16/f32  token reps tile
                       w_ref,        # (4, H)         bf16/f32  Linear(H, 4) weight (PyTorch layout)
                       bias_ref,     # (4, 1)         f32
                       tmask_ref,    # (1, 1, TILE_T) i32       token mask tile
                       sstart_ref,   # (1, S, 1)      i32       span starts
                       send_ref,     # (1, S, 1)      i32       span ends (inclusive)
                       svalid_ref,   # (1, S, 1)      i32       (span_label>0) & span_mask
                       logits_ref,   # (1, 4, TILE_T) f32  out: logits (class-major)
                       preds_ref,    # (1, 1, TILE_T) i32  out: argmax preds, -1 where masked
                       labels_ref,   # (1, 1, TILE_T) i32  out: BECO token labels
                       ce_ref):      # (1, 1, TILE_T) f32  out: per-token masked CE terms
    tile_t = reps_ref.shape[1]
    t_idx = pl.program_id(1)

    # ---- linear head on the MXU: (4, H) x (TILE_T, H)^T -> (4, TILE_T), tokens in lanes ----
    reps = reps_ref[0]                                          # (TILE_T, H)
    logits = jax.lax.dot_general(
        w_ref[...], reps,
        dimension_numbers=(((1,), (1,)), ((), ())),
        preferred_element_type=jnp.float32)                     # (4, TILE_T) f32
    logits = logits + bias_ref[...]                             # lane-broadcast bias
    logits_ref[0] = logits

    tmask = tmask_ref[0] != 0                                   # (1, TILE_T) bool

    cls_i = jax.lax.broadcasted_iota(jnp.int32, (4, tile_t), 0)  # class index per sublane
    cls_f = cls_i.astype(jnp.float32)

    # ---- argmax over classes (first index of max) via sublane max + min-index ----
    best = jnp.max(logits, axis=0, keepdims=True)               # (1, TILE_T)
    pred = jnp.min(jnp.where(logits == best, cls_f, 4.0),
                   axis=0, keepdims=True).astype(jnp.int32)
    preds_ref[0] = jnp.where(tmask, pred, -1).astype(jnp.int32)

    # ---- BECO labels from positive spans (vectorized over all S spans) ----
    pos = (jax.lax.broadcasted_iota(jnp.int32, (1, tile_t), 1)
           + t_idx * tile_t)                                    # GLOBAL token positions
    valid = svalid_ref[0] != 0                                  # (S, 1)
    starts = sstart_ref[0]                                      # (S, 1)
    ends_inc = send_ref[0]                                      # (S, 1) inclusive ends
    hit_b = jnp.where(valid & (starts == pos), 1.0, 0.0)        # (S, TILE_T)
    hit_e = jnp.where(valid & (ends_inc == pos), 1.0, 0.0)
    is_b = jnp.max(hit_b, axis=0, keepdims=True) > 0.0          # (1, TILE_T)
    is_e = jnp.max(hit_e, axis=0, keepdims=True) > 0.0
    labels = jnp.where(is_b & is_e, C_CLASS,
              jnp.where(is_e, E_CLASS,
               jnp.where(is_b, B_CLASS, O_CLASS)))
    labels = jnp.where(tmask, labels, O_CLASS).astype(jnp.int32)
    labels_ref[0] = labels

    # ---- masked per-token cross-entropy contributions (reduced in the wrapper) ----
    logz = best + jnp.log(jnp.sum(jnp.exp(logits - best), axis=0, keepdims=True))
    picked = jnp.sum(jnp.where(cls_i == labels, logits, 0.0), axis=0, keepdims=True)
    ce_ref[0] = jnp.where(tmask, logz - picked, 0.0)


@functools.partial(jax.jit, static_argnames=("tile_t", "compute_dtype"))
def token_tagger_forward(token_reps, token_masks, span_ids, span_masks, span_labels,
                         weight, bias, *, tile_t=512, compute_dtype=jnp.bfloat16):
    """BECO TokenTagger forward. Returns dict with token_logits, token_preds,
    token_labels and tagger_loss."""
    B, T, H = token_reps.shape
    S = span_ids.shape[1]

    # T-tile: multiple of 128 lanes, capped at `tile_t` (default 512 keeps 2x double-buffered
    # bf16 reps tiles well under the scoped VMEM limit on v5e/v6e/v7x even for large H).
    t_tile = min(int(tile_t), max(128, pl.cdiv(T, 128) * 128))
    nt = pl.cdiv(T, t_tile)
    t_pad = nt * t_tile

    # glue: layout plumbing only (no heavy compute, no transpose of the big activation)
    reps = token_reps
    tmask = token_masks.astype(jnp.int32)
    if t_pad != T:
        reps = jnp.pad(reps, ((0, 0), (0, t_pad - T), (0, 0)))
        tmask = jnp.pad(tmask, ((0, 0), (0, t_pad - T)))
    reps = reps.astype(compute_dtype)                           # (B, t_pad, H)
    tmask3 = tmask.reshape(B, 1, t_pad)

    sstart = span_ids[..., 0].astype(jnp.int32)[:, :, None]                      # (B, S, 1)
    send_inc = (span_ids[..., 1].astype(jnp.int32) - 1)[:, :, None]              # inclusive end
    svalid = ((span_labels > 0) & (span_masks != 0)).astype(jnp.int32)[:, :, None]
    w = weight.astype(compute_dtype)                            # (4, H)
    bias2d = bias.reshape(4, 1).astype(jnp.float32)

    grid = (B, nt)
    out_shape = (
        jax.ShapeDtypeStruct((B, 4, t_pad), jnp.float32),   # logits (class-major)
        jax.ShapeDtypeStruct((B, 1, t_pad), jnp.int32),     # preds
        jax.ShapeDtypeStruct((B, 1, t_pad), jnp.int32),     # BECO labels
        jax.ShapeDtypeStruct((B, 1, t_pad), jnp.float32),   # per-token masked CE terms
    )
    in_specs = [
        pl.BlockSpec((1, t_tile, H), lambda b, t: (b, t, 0)),
        pl.BlockSpec((4, H), lambda b, t: (0, 0)),
        pl.BlockSpec((4, 1), lambda b, t: (0, 0)),
        pl.BlockSpec((1, 1, t_tile), lambda b, t: (b, 0, t)),
        pl.BlockSpec((1, S, 1), lambda b, t: (b, 0, 0)),
        pl.BlockSpec((1, S, 1), lambda b, t: (b, 0, 0)),
        pl.BlockSpec((1, S, 1), lambda b, t: (b, 0, 0)),
    ]
    out_specs = (
        pl.BlockSpec((1, 4, t_tile), lambda b, t: (b, 0, t)),
        pl.BlockSpec((1, 1, t_tile), lambda b, t: (b, 0, t)),
        pl.BlockSpec((1, 1, t_tile), lambda b, t: (b, 0, t)),
        pl.BlockSpec((1, 1, t_tile), lambda b, t: (b, 0, t)),
    )
    itemsize = jnp.dtype(compute_dtype).itemsize
    cost = pl.CostEstimate(
        flops=2 * B * t_pad * H * 4,
        transcendentals=5 * B * t_pad,                          # 4 exp + 1 log per token
        bytes_accessed=(B * t_pad * H * itemsize + 4 * H * itemsize
                        + B * t_pad * 4                          # token mask
                        + B * t_pad * (16 + 4 + 4 + 4)),         # outputs
    )

    logits_cm, preds, labels, ce = pl.pallas_call(
        beco_tagger_kernel,
        out_shape=out_shape,
        grid=grid,
        in_specs=in_specs,
        out_specs=out_specs,
        compiler_params=pltpu.CompilerParams(
            dimension_semantics=("parallel", "parallel")),
        cost_estimate=cost,
    )(reps, w, bias2d, tmask3, sstart, send_inc, svalid)

    # wrapper-side finishing: transpose the tiny logits tensor back to (B, T, 4),
    # strip padding, reduce the per-token CE partials (sum / max(count, 1)).
    token_logits = jnp.transpose(logits_cm, (0, 2, 1))[:, :T, :]
    token_preds = preds[:, 0, :T]
    token_labels = labels[:, 0, :T]
    n_valid = jnp.maximum(jnp.sum(token_masks.astype(jnp.float32)), 1.0)
    tagger_loss = jnp.sum(ce) / n_valid

    return dict(
        token_logits=token_logits,
        token_preds=token_preds,
        token_labels=token_labels,
        tagger_loss=tagger_loss,
    )


def _numpy_reference(token_reps, token_masks, span_ids, span_masks, span_labels, weight, bias):
    reps = np.asarray(token_reps, np.float32)
    W = np.asarray(weight, np.float32)
    b = np.asarray(bias, np.float32)
    tm = np.asarray(token_masks)
    sid = np.asarray(span_ids)
    sm = np.asarray(span_masks)
    sl = np.asarray(span_labels)
    B, T, _ = reps.shape

    logits = reps @ W.T + b
    preds = logits.argmax(-1)
    preds = np.where(tm, preds, -1)

    labels = np.full((B, T), O_CLASS, np.int64)
    for i in range(B):
        pos_idx = np.nonzero((sl[i] > 0) & sm[i])[0]
        pos_spans = sid[i][pos_idx]
        if pos_spans.size:
            Bi = np.unique(pos_spans[:, 0])
            Ei = np.unique(pos_spans[:, 1] - 1)
            Ci = Bi[np.isin(Bi, Ei)]
            labels[i][Bi] = B_CLASS
            labels[i][Ei] = E_CLASS
            labels[i][Ci] = C_CLASS
    labels = np.where(tm, labels, O_CLASS)

    m = logits.max(-1, keepdims=True)
    logz = m[..., 0] + np.log(np.exp(logits - m).sum(-1))
    picked = np.take_along_axis(logits, labels[..., None], -1)[..., 0]
    loss = float(((logz - picked) * tm).sum() / max(tm.sum(), 1))
    return logits, preds, labels, loss


if __name__ == "__main__":
    B, T, H, S = 2, 8, 32, 6

    key = jax.random.PRNGKey(0)
    k1, k2, k3, k4, k5 = jax.random.split(key, 5)

    token_reps = jax.random.normal(k1, (B, T, H), jnp.float32)
    token_masks = jnp.array([[True] * T,
                             [True] * 6 + [False] * 2], dtype=jnp.bool_)

    starts = jax.random.randint(k2, (B, S), 0, T - 1)
    lengths = jax.random.randint(k3, (B, S), 1, 4)
    ends = jnp.minimum(starts + lengths, T)
    span_ids = jnp.stack([starts, ends], axis=-1).astype(jnp.int32)
    span_masks = jnp.array([[1, 1, 1, 1, 0, 0],
                            [1, 1, 1, 0, 0, 0]], dtype=jnp.bool_)
    span_labels = jax.random.randint(k4, (B, S), 0, 3)

    # deterministic parameter init: xavier_uniform for Linear(H, 4) weight, zero bias
    limit = math.sqrt(6.0 / (H + 4))
    weight = jax.random.uniform(k5, (4, H), jnp.float32, -limit, limit)
    bias = jnp.zeros((4,), jnp.float32)

    out = token_tagger_forward(token_reps, token_masks, span_ids, span_masks, span_labels,
                               weight, bias)
    out = jax.block_until_ready(out)

    # reference uses the same bf16-rounded reps/weight the kernel feeds to the MXU
    reps_bf = np.asarray(token_reps.astype(jnp.bfloat16).astype(jnp.float32))
    w_bf = np.asarray(weight.astype(jnp.bfloat16).astype(jnp.float32))
    ref_logits, ref_preds, ref_labels, ref_loss = _numpy_reference(
        reps_bf, token_masks, span_ids, span_masks, span_labels, w_bf, bias)

    np.testing.assert_allclose(np.asarray(out["token_logits"]), ref_logits, rtol=1e-4, atol=1e-4)
    np.testing.assert_array_equal(np.asarray(out["token_preds"]), ref_preds)
    np.testing.assert_array_equal(np.asarray(out["token_labels"]), ref_labels)
    np.testing.assert_allclose(float(out["tagger_loss"]), ref_loss, rtol=1e-3, atol=1e-3)

    print("KERNEL_OK")
</pallas_src>

<mosaic_0001>
module attributes {stable_mosaic.version = 11 : i64} {
  func.func @beco_tagger_kernel(%arg0: i32, %arg1: i32, %arg2: memref<1x128x32xbf16, #tpu.memory_space<vmem>>, %arg3: memref<4x32xbf16, #tpu.memory_space<vmem>>, %arg4: memref<4x1xf32, #tpu.memory_space<vmem>>, %arg5: memref<1x1x128xi32, #tpu.memory_space<vmem>>, %arg6: memref<1x6x1xi32, #tpu.memory_space<vmem>>, %arg7: memref<1x6x1xi32, #tpu.memory_space<vmem>>, %arg8: memref<1x6x1xi32, #tpu.memory_space<vmem>>, %arg9: memref<1x4x128xf32, #tpu.memory_space<vmem>>, %arg10: memref<1x1x128xi32, #tpu.memory_space<vmem>>, %arg11: memref<1x1x128xi32, #tpu.memory_space<vmem>>, %arg12: memref<1x1x128xf32, #tpu.memory_space<vmem>>) attributes {dimension_semantics = [#tpu.dimension_semantics<parallel>, #tpu.dimension_semantics<parallel>], iteration_bounds = array<i64: 2, 1>, scalar_prefetch = 0 : i64, scratch_operands = 0 : i64, tpu.core_type = #tpu.core_type<tc>, window_params = [{transform_indices = @transform_0, window_bounds = array<i64: 1, 128, 32>}, {pipeline_mode = #tpu.pipeline_mode<synchronous>, transform_indices = @transform_1, window_bounds = array<i64: 4, 32>}, {pipeline_mode = #tpu.pipeline_mode<synchronous>, transform_indices = @transform_2, window_bounds = array<i64: 4, 1>}, {transform_indices = @transform_3, window_bounds = array<i64: 1, 1, 128>}, {transform_indices = @transform_4, window_bounds = array<i64: 1, 6, 1>}, {transform_indices = @transform_5, window_bounds = array<i64: 1, 6, 1>}, {transform_indices = @transform_6, window_bounds = array<i64: 1, 6, 1>}, {transform_indices = @transform_7, window_bounds = array<i64: 1, 4, 128>}, {transform_indices = @transform_8, window_bounds = array<i64: 1, 1, 128>}, {transform_indices = @transform_9, window_bounds = array<i64: 1, 1, 128>}, {transform_indices = @transform_10, window_bounds = array<i64: 1, 1, 128>}]} {
    %c0 = arith.constant 0 : index
    %c0_0 = arith.constant 0 : index
    %c0_1 = arith.constant 0 : index
    %0 = vector.load %arg2[%c0, %c0_0, %c0_1] : memref<1x128x32xbf16, #tpu.memory_space<vmem>>, vector<1x128x32xbf16>
    %1 = vector.shape_cast %0 : vector<1x128x32xbf16> to vector<128x32xbf16>
    %c0_2 = arith.constant 0 : index
    %c0_3 = arith.constant 0 : index
    %2 = vector.load %arg3[%c0_2, %c0_3] : memref<4x32xbf16, #tpu.memory_space<vmem>>, vector<4x32xbf16>
    %cst = arith.constant dense<0.000000e+00> : vector<4x128xf32>
    %3 = tpu.matmul %2, %1, %cst {dimension_numbers = #tpu.dot_dimension_numbers<[1], [1], [0], [0], [0, 0, 1, 0], [], []>} : vector<4x32xbf16>, vector<128x32xbf16>, vector<4x128xf32> -> vector<4x128xf32>
    %c0_4 = arith.constant 0 : index
    %c0_5 = arith.constant 0 : index
    %4 = vector.load %arg4[%c0_4, %c0_5] : memref<4x1xf32, #tpu.memory_space<vmem>>, vector<4x1xf32>
    %5 = vector.broadcast %4 : vector<4x1xf32> to vector<4x128xf32>
    %6 = arith.addf %3, %5 : vector<4x128xf32>
    %c0_6 = arith.constant 0 : index
    %c0_7 = arith.constant 0 : index
    %c0_8 = arith.constant 0 : index
    %7 = vector.load %arg9[%c0_6, %c0_7, %c0_8] : memref<1x4x128xf32, #tpu.memory_space<vmem>>, vector<1x4x128xf32>
    %8 = vector.shape_cast %7 : vector<1x4x128xf32> to vector<4x128xf32>
    %9 = vector.shape_cast %6 : vector<4x128xf32> to vector<1x4x128xf32>
    tpu.vector_store %arg9[%c0_6, %c0_7, %c0_8], %9 {strides = array<i32>} : memref<1x4x128xf32, #tpu.memory_space<vmem>>, vector<1x4x128xf32>,
    %c0_9 = arith.constant 0 : index
    %c0_10 = arith.constant 0 : index
    %c0_11 = arith.constant 0 : index
    %10 = vector.load %arg5[%c0_9, %c0_10, %c0_11] : memref<1x1x128xi32, #tpu.memory_space<vmem>>, vector<1x1x128xi32>
    %11 = vector.shape_cast %10 : vector<1x1x128xi32> to vector<1x128xi32>
    %c0_i32 = arith.constant 0 : i32
    %12 = vector.broadcast %c0_i32 : i32 to vector<1x128xi32>
    %13 = arith.cmpi ne, %11, %12 : vector<1x128xi32>
    %14 = tpu.iota {dimensions = array<i32: 0>} : vector<4x128xi32>
    %15 = arith.sitofp %14 : vector<4x128xi32> to vector<4x128xf32>
    %cst_12 = arith.constant dense<0xFF800000> : vector<128xf32>
    %16 = vector.multi_reduction <maximumf>, %6, %cst_12 [0] : vector<4x128xf32> to vector<128xf32>
    %17 = vector.shape_cast %16 : vector<128xf32> to vector<1x128xf32>
    %18 = vector.broadcast %17 : vector<1x128xf32> to vector<4x128xf32>
    %19 = arith.cmpf oeq, %6, %18 : vector<4x128xf32>
    %cst_13 = arith.constant 4.000000e+00 : f32
    %20 = vector.broadcast %cst_13 : f32 to vector<4x128xf32>
    %21 = arith.select %19, %15, %20 : vector<4x128xi1>, vector<4x128xf32>
    %cst_14 = arith.constant dense<0x7F800000> : vector<128xf32>
    %22 = vector.multi_reduction <minimumf>, %21, %cst_14 [0] : vector<4x128xf32> to vector<128xf32>
    %23 = vector.shape_cast %22 : vector<128xf32> to vector<1x128xf32>
    %24 = arith.fptosi %23 : vector<1x128xf32> to vector<1x128xi32>
    %c-1_i32 = arith.constant -1 : i32
    %25 = vector.broadcast %c-1_i32 : i32 to vector<1x128xi32>
    %26 = arith.select %13, %24, %25 : vector<1x128xi1>, vector<1x128xi32>
    %c0_15 = arith.constant 0 : index
    %c0_16 = arith.constant 0 : index
    %c0_17 = arith.constant 0 : index
    %27 = vector.load %arg10[%c0_15, %c0_16, %c0_17] : memref<1x1x128xi32, #tpu.memory_space<vmem>>, vector<1x1x128xi32>
    %28 = vector.shape_cast %27 : vector<1x1x128xi32> to vector<1x128xi32>
    %29 = vector.shape_cast %26 : vector<1x128xi32> to vector<1x1x128xi32>
    tpu.vector_store %arg10[%c0_15, %c0_16, %c0_17], %29 {strides = array<i32>} : memref<1x1x128xi32, #tpu.memory_space<vmem>>, vector<1x1x128xi32>,
    %30 = tpu.iota {dimensions = array<i32: 1>} : vector<1x128xi32>
    %c128_i32 = arith.constant 128 : i32
    %31 = arith.muli %arg1, %c128_i32 : i32
    %32 = vector.broadcast %31 : i32 to vector<1x128xi32>
    %33 = arith.addi %30, %32 : vector<1x128xi32>
    %c0_18 = arith.constant 0 : index
    %c0_19 = arith.constant 0 : index
    %c0_20 = arith.constant 0 : index
    %34 = vector.load %arg8[%c0_18, %c0_19, %c0_20] : memref<1x6x1xi32, #tpu.memory_space<vmem>>, vector<1x6x1xi32>
    %35 = vector.shape_cast %34 : vector<1x6x1xi32> to vector<6x1xi32>
    %c0_i32_21 = arith.constant 0 : i32
    %36 = vector.broadcast %c0_i32_21 : i32 to vector<6x1xi32>
    %37 = arith.cmpi ne, %35, %36 : vector<6x1xi32>
    %c0_22 = arith.constant 0 : index
    %c0_23 = arith.constant 0 : index
    %c0_24 = arith.constant 0 : index
    %38 = vector.load %arg6[%c0_22, %c0_23, %c0_24] : memref<1x6x1xi32, #tpu.memory_space<vmem>>, vector<1x6x1xi32>
    %39 = vector.shape_cast %38 : vector<1x6x1xi32> to vector<6x1xi32>
    %c0_25 = arith.constant 0 : index
    %c0_26 = arith.constant 0 : index
    %c0_27 = arith.constant 0 : index
    %40 = vector.load %arg7[%c0_25, %c0_26, %c0_27] : memref<1x6x1xi32, #tpu.memory_space<vmem>>, vector<1x6x1xi32>
    %41 = vector.shape_cast %40 : vector<1x6x1xi32> to vector<6x1xi32>
    %42 = vector.broadcast %39 : vector<6x1xi32> to vector<6x128xi32>
    %43 = vector.broadcast %33 : vector<1x128xi32> to vector<6x128xi32>
    %44 = arith.cmpi eq, %42, %43 : vector<6x128xi32>
    %45 = vector.broadcast %37 : vector<6x1xi1> to vector<6x128xi1>
    %46 = arith.andi %45, %44 : vector<6x128xi1>
    %cst_28 = arith.constant 1.000000e+00 : f32
    %cst_29 = arith.constant 0.000000e+00 : f32
    %47 = vector.broadcast %cst_28 : f32 to vector<6x128xf32>
    %48 = vector.broadcast %cst_29 : f32 to vector<6x128xf32>
    %49 = arith.select %46, %47, %48 : vector<6x128xi1>, vector<6x128xf32>
    %50 = vector.broadcast %41 : vector<6x1xi32> to vector<6x128xi32>
    %51 = vector.broadcast %33 : vector<1x128xi32> to vector<6x128xi32>
    %52 = arith.cmpi eq, %50, %51 : vector<6x128xi32>
    %53 = vector.broadcast %37 : vector<6x1xi1> to vector<6x128xi1>
    %54 = arith.andi %53, %52 : vector<6x128xi1>
    %cst_30 = arith.constant 1.000000e+00 : f32
    %cst_31 = arith.constant 0.000000e+00 : f32
    %55 = vector.broadcast %cst_30 : f32 to vector<6x128xf32>
    %56 = vector.broadcast %cst_31 : f32 to vector<6x128xf32>
    %57 = arith.select %54, %55, %56 : vector<6x128xi1>, vector<6x128xf32>
    %cst_32 = arith.constant dense<0xFF800000> : vector<128xf32>
    %58 = vector.multi_reduction <maximumf>, %49, %cst_32 [0] : vector<6x128xf32> to vector<128xf32>
    %59 = vector.shape_cast %58 : vector<128xf32> to vector<1x128xf32>
    %cst_33 = arith.constant 0.000000e+00 : f32
    %60 = vector.broadcast %cst_33 : f32 to vector<1x128xf32>
    %61 = arith.cmpf ogt, %59, %60 : vector<1x128xf32>
    %cst_34 = arith.constant dense<0xFF800000> : vector<128xf32>
    %62 = vector.multi_reduction <maximumf>, %57, %cst_34 [0] : vector<6x128xf32> to vector<128xf32>
    %63 = vector.shape_cast %62 : vector<128xf32> to vector<1x128xf32>
    %cst_35 = arith.constant 0.000000e+00 : f32
    %64 = vector.broadcast %cst_35 : f32 to vector<1x128xf32>
    %65 = arith.cmpf ogt, %63, %64 : vector<1x128xf32>
    %66 = arith.andi %61, %65 : vector<1x128xi1>
    %c0_i32_36 = arith.constant 0 : i32
    %c3_i32 = arith.constant 3 : i32
    %67 = vector.broadcast %c0_i32_36 : i32 to vector<1x128xi32>
    %68 = vector.broadcast %c3_i32 : i32 to vector<1x128xi32>
    %69 = arith.select %61, %67, %68 : vector<1x128xi1>, vector<1x128xi32>
    %c1_i32 = arith.constant 1 : i32
    %70 = vector.broadcast %c1_i32 : i32 to vector<1x128xi32>
    %71 = arith.select %65, %70, %69 : vector<1x128xi1>, vector<1x128xi32>
    %c2_i32 = arith.constant 2 : i32
    %72 = vector.broadcast %c2_i32 : i32 to vector<1x128xi32>
    %73 = arith.select %66, %72, %71 : vector<1x128xi1>, vector<1x128xi32>
    %c3_i32_37 = arith.constant 3 : i32
    %74 = vector.broadcast %c3_i32_37 : i32 to vector<1x128xi32>
    %75 = arith.select %13, %73, %74 : vector<1x128xi1>, vector<1x128xi32>
    %c0_38 = arith.constant 0 : index
    %c0_39 = arith.constant 0 : index
    %c0_40 = arith.constant 0 : index
    %76 = vector.load %arg11[%c0_38, %c0_39, %c0_40] : memref<1x1x128xi32, #tpu.memory_space<vmem>>, vector<1x1x128xi32>
    %77 = vector.shape_cast %76 : vector<1x1x128xi32> to vector<1x128xi32>
    %78 = vector.shape_cast %75 : vector<1x128xi32> to vector<1x1x128xi32>
    tpu.vector_store %arg11[%c0_38, %c0_39, %c0_40], %78 {strides = array<i32>} : memref<1x1x128xi32, #tpu.memory_space<vmem>>, vector<1x1x128xi32>,
    %79 = vector.broadcast %17 : vector<1x128xf32> to vector<4x128xf32>
    %80 = arith.subf %6, %79 : vector<4x128xf32>
    %81 = math.exp %80 : vector<4x128xf32>
    %cst_41 = arith.constant dense<0.000000e+00> : vector<128xf32>
    %82 = vector.multi_reduction <add>, %81, %cst_41 [0] : vector<4x128xf32> to vector<128xf32>
    %83 = vector.shape_cast %82 : vector<128xf32> to vector<1x128xf32>
    %84 = math.log %83 : vector<1x128xf32>
    %85 = arith.addf %17, %84 : vector<1x128xf32>
    %86 = vector.broadcast %75 : vector<1x128xi32> to vector<4x128xi32>
    %87 = arith.cmpi eq, %14, %86 : vector<4x128xi32>
    %cst_42 = arith.constant 0.000000e+00 : f32
    %88 = vector.broadcast %cst_42 : f32 to vector<4x128xf32>
    %89 = arith.select %87, %6, %88 : vector<4x128xi1>, vector<4x128xf32>
    %cst_43 = arith.constant dense<0.000000e+00> : vector<128xf32>
    %90 = vector.multi_reduction <add>, %89, %cst_43 [0] : vector<4x128xf32> to vector<128xf32>
    %91 = vector.shape_cast %90 : vector<128xf32> to vector<1x128xf32>
    %92 = arith.subf %85, %91 : vector<1x128xf32>
    %cst_44 = arith.constant 0.000000e+00 : f32
    %93 = vector.broadcast %cst_44 : f32 to vector<1x128xf32>
    %94 = arith.select %13, %92, %93 : vector<1x128xi1>, vector<1x128xf32>
    %c0_45 = arith.constant 0 : index
    %c0_46 = arith.constant 0 : index
    %c0_47 = arith.constant 0 : index
    %95 = vector.load %arg12[%c0_45, %c0_46, %c0_47] : memref<1x1x128xf32, #tpu.memory_space<vmem>>, vector<1x1x128xf32>
    %96 = vector.shape_cast %95 : vector<1x1x128xf32> to vector<1x128xf32>
    %97 = vector.shape_cast %94 : vector<1x128xf32> to vector<1x1x128xf32>
    tpu.vector_store %arg12[%c0_45, %c0_46, %c0_47], %97 {strides = array<i32>} : memref<1x1x128xf32, #tpu.memory_space<vmem>>, vector<1x1x128xf32>,
    return
  }
  func.func @transform_0(%arg0: i32, %arg1: i32) -> (i32, i32, i32) {
    %c0_i32 = arith.constant 0 : i32
    %c0_i32_0 = arith.constant 0 : i32
    return %arg0, %arg1, %c0_i32 : i32, i32, i32
  }
  func.func @transform_1(%arg0: i32, %arg1: i32) -> (i32, i32) {
    %c0_i32 = arith.constant 0 : i32
    %c0_i32_0 = arith.constant 0 : i32
    %c0_i32_1 = arith.constant 0 : i32
    return %c0_i32, %c0_i32_0 : i32, i32
  }
  func.func @transform_2(%arg0: i32, %arg1: i32) -> (i32, i32) {
    %c0_i32 = arith.constant 0 : i32
    %c0_i32_0 = arith.constant 0 : i32
    %c0_i32_1 = arith.constant 0 : i32
    return %c0_i32, %c0_i32_0 : i32, i32
  }
  func.func @transform_3(%arg0: i32, %arg1: i32) -> (i32, i32, i32) {
    %c0_i32 = arith.constant 0 : i32
    %c0_i32_0 = arith.constant 0 : i32
    return %arg0, %c0_i32, %arg1 : i32, i32, i32
  }
  func.func @transform_4(%arg0: i32, %arg1: i32) -> (i32, i32, i32) {
    %c0_i32 = arith.constant 0 : i32
    %c0_i32_0 = arith.constant 0 : i32
    %c0_i32_1 = arith.constant 0 : i32
    return %arg0, %c0_i32, %c0_i32_0 : i32, i32, i32
  }
  func.func @transform_5(%arg0: i32, %arg1: i32) -> (i32, i32, i32) {
    %c0_i32 = arith.constant 0 : i32
    %c0_i32_0 = arith.constant 0 : i32
    %c0_i32_1 = arith.constant 0 : i32
    return %arg0, %c0_i32, %c0_i32_0 : i32, i32, i32
  }
  func.func @transform_6(%arg0: i32, %arg1: i32) -> (i32, i32, i32) {
    %c0_i32 = arith.constant 0 : i32
    %c0_i32_0 = arith.constant 0 : i32
    %c0_i32_1 = arith.constant 0 : i32
    return %arg0, %c0_i32, %c0_i32_0 : i32, i32, i32
  }
  func.func @transform_7(%arg0: i32, %arg1: i32) -> (i32, i32, i32) {
    %c0_i32 = arith.constant 0 : i32
    %c0_i32_0 = arith.constant 0 : i32
    return %arg0, %c0_i32, %arg1 : i32, i32, i32
  }
  func.func @transform_8(%arg0: i32, %arg1: i32) -> (i32, i32, i32) {
    %c0_i32 = arith.constant 0 : i32
    %c0_i32_0 = arith.constant 0 : i32
    return %arg0, %c0_i32, %arg1 : i32, i32, i32
  }
  func.func @transform_9(%arg0: i32, %arg1: i32) -> (i32, i32, i32) {
    %c0_i32 = arith.constant 0 : i32
    %c0_i32_0 = arith.constant 0 : i32
    return %arg0, %c0_i32, %arg1 : i32, i32, i32
  }
  func.func @transform_10(%arg0: i32, %arg1: i32) -> (i32, i32, i32) {
    %c0_i32 = arith.constant 0 : i32
    %c0_i32_0 = arith.constant 0 : i32
    return %arg0, %c0_i32, %arg1 : i32, i32, i32
  }
}

</mosaic_0001>

<bundles_post_ra>
// kernel: token_tagger_forward.1
= control target key start
LH: loop header
LB: loop body
LE: loop exit
PB: predicated region body
PF: predicated region fallthrough
CT: control target
= control target key end

     0   :  { %s1616_s0 = inlined_call_operand.vmem [shape: bf16[2,128,32], index: 0, kind: input, shape index: {}]   ;;  %s1617_s1 = inlined_call_operand.vmem [shape: bf16[4,32], index: 1, kind: input, shape index: {}]   ;;  %s1618_s2 = inlined_call_operand.vmem [shape: f32[4,1], index: 2, kind: input, shape index: {}]   ;;  %s1619_s3 = inlined_call_operand.vmem [shape: s32[2,1,128], index: 3, kind: input, shape index: {}]   ;;  %s1620_s4 = inlined_call_operand.vmem [shape: s32[2,6,1], index: 4, kind: input, shape index: {}]   ;;  %s1621_s5 = inlined_call_operand.vmem [shape: s32[2,6,1], index: 5, kind: input, shape index: {}]   ;;  %s1622_s6 = inlined_call_operand.vmem [shape: s32[2,6,1], index: 6, kind: input, shape index: {}]   ;;  %s1623_s7 = inlined_call_operand.hbm [shape: f32[2,4,128], index: 7, kind: output, shape index: {0}]   ;;  %s1624_s8 = inlined_call_operand.hbm [shape: s32[2,1,128], index: 8, kind: output, shape index: {1}]   ;;  %s1625_s9 = inlined_call_operand.hbm [shape: s32[2,1,128], index: 9, kind: output, shape index: {2}]   ;;  %s1626_s10 = inlined_call_operand.vmem [shape: f32[2,1,128], index: 10, kind: output, shape index: {3}]  }
   0x1   :  { %1630 = sst [smem:[#allocation9_spill]] %s1616_s0 }
   0x2   :  { %1631 = sst [smem:[#allocation10_spill]] %s1617_s1 }
   0x3   :  { %1632 = sst [smem:[#allocation11_spill]] %s1618_s2 }
   0x4   :  { %1633 = sst [smem:[#allocation12_spill]] %s1619_s3 }
   0x5   :  { %16 = vsyncpa [#allocation3], 0 }
   0x6   :  { %18 = vsyncpa [#allocation3 + $0x1], 0 }
   0x7   :  { %19 = vsyncpa [#allocation5], 0 }
   0x8   :  { %21 = vsyncpa [#allocation5 + $0x1], 0  ;;  %s1342_s13 = smov 0   ;;  %s1344_s14 = smov 0  }
   0x9   :  { %s1346_s15 = smov 0   ;;  %s1348_s16 = smov 0  }
   0xa   :  { %s1350_s17 = smov 0   ;;  %s1352_s18 = smov 0  }
   0xb LB: > { %s1628_s19 = sadd.s32 4294967295, %s1278_s18   ;;  %s1627_s20 = sadd.s32 4294967294, %s1278_s18   ;;  %s1278_s18 = sphi %s1352_s18, %s27_s18   ;;  %s1274_s17 = sphi %s1350_s17, %s1647_s17   ;;  %s1270_s16 = sphi %s1348_s16, %s1646_s16   ;;  %s1266_s15 = sphi %s1346_s15, %s1645_s15   ;;  %s1262_s14 = sphi %s1344_s14, %s1644_s14   ;;  %s1258_s13 = sphi %s1342_s13, %s1643_s13  }
   0xc   : > { %s39_s21 = sadd.s32 1, %s1274_s17  ;;  %s224_s22 = sadd.s32 1, %s1266_s15 }
   0xd   : > { %p41_p0 = scmp.ge.s32.totalorder %s39_s21, 2  ;;  %p234_p1 = scmp.ne.s32.totalorder %s1266_s15, %s1262_s14 }
   0xe   : > { %p235_p2 = scmp.eq.s32.totalorder %s1628_s19, 1  ;;  %p240_p3 = scmp.ne.s32.totalorder %s1262_s14, %s1258_s13 }
   0xf   : > { %s1649_s21 = smov (%p41_p0, %s39_s21), 0  ;;  %p241_p5 = scmp.eq.s32.totalorder %s1627_s20, 1 }
  0x10   : > { %p1384_p4 = por %p235_p2, %p234_p1  ;;  %s219_s24 = ssub.s32 %s1274_s17, %s1649_s21 }
  0x11   : > { %p1003_p6 = scmp.ge.s32.totalorder %s1278_s18, 1  ;;  %p222_p7 = scmp.eq.s32.totalorder %s219_s24, 0 }
  0x12   : > { %p1393_p8 = por %p241_p5, %p240_p3  ;;  %p392_p9 = scmp.lt.s32.totalorder %s1278_s18, 3 }
  0x13   : > { %s1399_s26 = scalar_select %p222_p7, %s1266_s15, %s224_s22  }
  0x14   : > { %p393_p10 = pnand %p1003_p6, %p392_p9 }
  0x15   : > { %p467_p11 = scmp.lt.s32.totalorder (!%p393_p10), %s1270_s16, 1  ;;  %v1280_v0 = vmov (!%p393_p10), 0.0   ;;  %vm1281_vm0 = vmmov (!%p393_p10), 0   ;;  %s1636_s2 = sld [smem:[#allocation11_spill]] (!%p393_p10)  ;;  %v1282_v2 = vmov (!%p393_p10), 0   ;;  %vm564_vm1 = vcmask (!%p393_p10), 261120  }
  0x16   : > { %396 = sbr.rel (%p393_p10) target bundleno = 414 (0x19e), region = 48  ;;  %1035 = vmatprep.subr.bf16.mxu0 (!%p393_p10), %v1280_v0  ;;  %1051 = vmatprep.mubr.msk.bf16.mxu0 (!%p393_p10), %vm1281_vm0, %v1280_v0  ;;  %s1637_s0 = sld [smem:[#allocation9_spill]] (!%p393_p10)  ;;  %v635_v24 = vlaneseq (!%p393_p10)  ;;  %vm684_vm5 = vcmask (!%p393_p10), 1045504   ;;  %v1283_v48 = vmov (!%p393_p10), 3   ;;  %vm638_vm14 = vcmask (!%p393_p10), 1043456  }
  0x17   : > { %1126 = vset.pattern.permute.xlu0 (!%p393_p10), %v1282_v2  ;;  %1127 = vset.pattern.permute.xlu1 (!%p393_p10), %v1282_v2  ;;  %s1638_s1 = sld [smem:[#allocation10_spill]] (!%p393_p10)  ;;  %s1639_s3 = sld [smem:[#allocation12_spill]] (!%p393_p10) }
  0x18   : > { %v659_v26 = vand.u32 (!%p393_p10), 127, %v635_v24  ;;  %v1459_v44 = vshrl.u32 (!%p393_p10), %v635_v24, 7  ;;  %s1020_s11 = sshll.u32 (!%p393_p10), %s1270_s16, 6 }
  0x19   : > { %s1479_s19 = scalar_lea.hbm (!%p393_p10), %s1623_s7, %s1020_s11 }
  0x1a   : > { %v722_v50 = vsub.s32 (!%p393_p10), 0, %v1459_v44 }
  0x1b   : > { %v518_v1 = vld [vmem:[%s1636_s2] sm:$0xf] (!%p393_p10) }
  0x1c   : > { %521 = vperm.xlu0 (!%p393_p10), %1126, %v518_v1  }
  0x1d   : > { %s1408_s29 = scalar_select %p467_p11, %s1270_s16, 1  ;;  %v517_v23 = vld [vmem:[%s1638_s1] sm:$0x3] }
  0x1f   : > { %s1025_s30 = sshll.u32 %s1408_s29, 6  ;;  %s1007_s24 = sshll.u32 %s1408_s29, 3 }
  0x20   : > { %s1414_s22 = scalar_lea.vmem %s1637_s0, %s1025_s30  ;;  %s493_s20 = scalar_lea.vmem %s1622_s6, %s1007_s24 }
  0x21   : > { %v1128_v3 = vld [vmem:[%s1414_s22] sm:$0xff]   ;;  %v1129_v5 = vld [vmem:[%s1414_s22 + $0x8] sm:$0xff]   ;;  %s485_s30 = scalar_lea.vmem %s1620_s4, %s1007_s24  ;;  %s489_s2 = scalar_lea.vmem %s1621_s5, %s1007_s24  ;;  %v1130_v10 = vld [vmem:[%s1414_s22 + $0x10] sm:$0xff]  }
  0x22   : > { %v569_v4 = vsel %vm564_vm1, %v1128_v3, 0  ;;  %v572_v6 = vsel %vm564_vm1, %v1129_v5, 0  ;;  %v663_v7 = vld [vmem:[%s493_s20] sm:$0x3f]  ;;  %v575_v12 = vsel %vm564_vm1, %v1130_v10, 0  ;;  %v1131_v13 = vld [vmem:[%s1414_s22 + $0x18] sm:$0xff]  }
  0x23   : > { %1036 = vmatpush3.bf16.xpose.msra.mxu0 %v569_v4  ;;  %v665_v8 = vld [vmem:[%s485_s30] sm:$0x3f]  ;;  %vm664_vm2 = vcmp.ne.s32.totalorder %v663_v7, 0  ;;  %v578_v14 = vsel %vm564_vm1, %v1131_v13, 0  ;;  %v1133_v17 = vld [vmem:[%s1414_s22 + $0x28] sm:$0xff]   ;;  %v1134_v19 = vld [vmem:[%s1414_s22 + $0x30] sm:$0xff]  }
  0x24   : > { %1037 = vmatprep.subr.bf16.mxu0 %v1280_v0  ;;  %668 = vperm.xlu0 %1126, %v665_v8   ;;  %v671_v9 = vsel %vm664_vm2, 1, %v1282_v2  ;;  %v666_v11 = vld [vmem:[%s489_s2] sm:$0x3f]  ;;  %v584_v18 = vsel %vm564_vm1, %v1133_v17, 0  ;;  %v587_v20 = vsel %vm564_vm1, %v1134_v19, 0  ;;  %v1135_v21 = vld [vmem:[%s1414_s22 + $0x38] sm:$0xff]  }
  0x25   : > { %673 = vperm.xlu1 %1127, %v671_v9   ;;  %v1132_v15 = vld [vmem:[%s1414_s22 + $0x20] sm:$0xff]   ;;  %v590_v22 = vsel %vm564_vm1, %v1135_v21, 0  ;;  %s481_s22 = scalar_lea.vmem %s1639_s3, %s1408_s29  ;;  %s1466_s24 = sand.u32 1, %s1262_s14  }
  0x26   : > { %v581_v16 = vsel %vm564_vm1, %v1132_v15, 0  ;;  %v1461_v46 = vld [vmem:[%s481_s22] sm:$0x1]  ;;  %s1629_s27 = scalar_lea.vmem [#allocation6], %s1466_s24  ;;  %s1004_s28 = sshll.u32 %s1466_s24, 2 }
  0x27   : > { %vm634_vm11 = vcmp.ne.s32.totalorder %v1461_v46, 0  ;;  %s445_s30 = scalar_lea.vmem [#allocation2], %s1004_s28  ;;  %s737_s20 = scalar_lea.sflag [#allocation3], %s1466_s24 }
  0x28   : > { %s765_s12 = sshll.u32 %s445_s30, 4  ;;  %s1284_s28 = smov [#allocation2]   ;;  %s1481_s12 = int_to_ptr.vmem [resolvable:$true] %s765_s12 }
  0x29   : > { %679 = vperm.xlu1 %1127, %v666_v11   ;;  %s1140_s22 = scalar_lea.vmem %s1481_s12, 64  ;;  %s1144_s11 = sshll.u32 %s1284_s28, 4  ;;  %s1145_s11 = int_to_ptr.vmem [resolvable:$false] %s1144_s11 }
  0x2a   : > { %p1141_p12 = scmp.ne.s32.totalorder %s1481_s12, %s1140_s22  ;;  %s1146_s0 = scalar_lea.vmem %s1145_s11, 128 }
  0x2b   : > { %1038 = vmatpush3.bf16.xpose.msra.mxu0 %v572_v6  ;;  %p1147_p1 = scmp.lt.s32.totalorder %s1481_s12, %s1145_s11  ;;  %p1148_p2 = scmp.lt.s32.totalorder %s1146_s0, %s1140_s22 }
  0x2c   : > { %1039 = vmatprep.subr.bf16.mxu0 %v1280_v0  ;;  %p1142_p13 = pnand %p1141_p12, %p1384_p4 }
  0x2d   : > { %p1149_p3 = por %p1148_p2, %p1147_p1 }
  0x2e   : > { %p1143_p0 = pneg %p1142_p13 }
  0x30   : > { %p1150_p5 = pnand %p1149_p3, %p1143_p0 }
  0x33   : > { %1040 = vmatpush3.bf16.xpose.msra.mxu0 %v575_v12 }
  0x34   : > { %1041 = vmatprep.subr.bf16.mxu0 %v1280_v0 }
  0x3b   : > { %1042 = vmatpush3.bf16.xpose.msra.mxu0 %v578_v14 }
  0x3c   : > { %1043 = vmatprep.subr.bf16.mxu0 %v1280_v0 }
  0x43   : > { %1044 = vmatpush3.bf16.xpose.msra.mxu0 %v581_v16 }
  0x44   : > { %1045 = vmatprep.subr.bf16.mxu0 %v1280_v0 }
  0x4b   : > { %1046 = vmatpush3.bf16.xpose.msra.mxu0 %v584_v18 }
  0x4c   : > { %1047 = vmatprep.subr.bf16.mxu0 %v1280_v0 }
  0x53   : > { %1048 = vmatpush3.bf16.xpose.msra.mxu0 %v587_v20 }
  0x54   : > { %1049 = vmatprep.subr.bf16.mxu0 %v1280_v0 }
  0x5b   : > { %1050 = vmatpush3.bf16.xpose.msra.mxu0 %v590_v22 }
  0x62   : > { %1052 = vmatmul.mubr.msk.bf16.vlgmr.msra.gmra.mrb[0].mxu0 %vm564_vm1, %v517_v23 }
  0x9b   : > { %v522_v25 = vpop.permute.xlu0 %521 }
  0xa3   : > { %v669_v27 = vpop.permute.xlu0 %668 }
  0xa4   : > { %vm670_vm3 = vcmp.eq.s32.totalorder %v669_v27, %v659_v26  ;;  %v674_v28 = vpop.permute.xlu1 %673 }
  0xa5   : > { %vm675_vm4 = vcmp.eq.s32.totalorder %v674_v28, 1 }
  0xa6   : > { %vm676_vm6 = vmand %vm675_vm4, %vm670_vm3 }
  0xa7   : > { %v677_v29 = vsel %vm676_vm6, 1.0, %v1280_v0 }
  0xa8   : > { %v685_v30 = vsel %vm684_vm5, %v677_v29, -inf  ;;  %v680_v31 = vpop.permute.xlu1 %679 }
  0xa9   : > { %v686_v32 = vrot.slane %v685_v30, 4  ;;  %vm681_vm7 = vcmp.eq.s32.totalorder %v680_v31, %v659_v26 }
  0xaa   : > { %vm682_vm8 = vmand %vm675_vm4, %vm681_vm7 }
  0xab   : > { %v687_v33 = vmax.f32 %v685_v30, %v686_v32  ;;  %v683_v34 = vsel %vm682_vm8, 1.0, %v1280_v0 }
  0xac   : > { %v693_v35 = vsel %vm684_vm5, %v683_v34, -inf }
  0xad   : > { %v688_v36 = vrot.slane %v687_v33, 2  ;;  %v694_v37 = vrot.slane %v693_v35, 4 }
  0xaf   : > { %v689_v38 = vmax.f32 %v687_v33, %v688_v36  ;;  %v695_v39 = vmax.f32 %v693_v35, %v694_v37 }
  0xb1   : > { %v690_v40 = vrot.slane %v689_v38, 1  ;;  %v696_v41 = vrot.slane %v695_v39, 2 }
  0xb3   : > { %v691_v42 = vmax.f32 %v689_v38, %v690_v40  ;;  %v697_v43 = vmax.f32 %v695_v39, %v696_v41 }
  0xb5   : > { %vm692_vm9 = vcmp.gt.f32.partialorder %v691_v42, 0.0  ;;  %v698_v45 = vrot.slane %v697_v43, 1 }
  0xb6   : > { %v702_v49 = vsel %vm692_vm9, 0, %v1283_v48 }
  0xb7   : > { %v699_v47 = vmax.f32 %v697_v43, %v698_v45 }
  0xb9   : > { %vm700_vm10 = vcmp.gt.f32.partialorder %v699_v47, 0.0 }
  0xba   : > { %vm701_vm12 = vmand %vm692_vm9, %vm700_vm10  ;;  %v703_v51 = vsel %vm700_vm10, 1, %v702_v49 }
  0xbb   : > { %v704_v52 = vsel %vm701_vm12, 2, %v703_v51 }
  0xbc   : > { %v705_v53 = vsel %vm634_vm11, %v704_v52, 3 }
  0xbd   : > { %v723_v54 = vrot.slane %v705_v53, %v722_v50  ;;  %706 = vst [vmem:[%s1629_s27] sm:$0x1] %v705_v53 }
  0xbf   : > { %vm724_vm13 = vcmp.eq.s32.totalorder %v1459_v44, %v723_v54 }
 0x135   : > { %v626_v55 = vpop.f32.mrb[0].mxu0 }
 0x136   : > { %v627_v56 = vadd.f32 %v626_v55, %v522_v25  ;;  %v1053_v57 = vpop.f32.mrb[1].mxu0 }
 0x137   : > { %v629_v58 = vpop.f32.mrb[2].mxu0 }
 0x138   : > { %v639_v59 = vsel %vm638_vm14, %v627_v56, -inf  ;;  %v1054_v60 = vpop.f32.mrb[3].mxu0  ;;  %632 = vst [vmem:[%s445_s30] sm:$0xf] %v627_v56  ;;  %v725_v61 = vsel %vm724_vm13, %v627_v56, 0.0 }
 0x139   : > { %v640_v62 = vrot.slane %v639_v59, 4 }
 0x13a   : > { %1153 = shalt.err (!%p1150_p5)
}
 0x13b   : > { %s1154_s30 = scalar_lea.hbm %s1479_s19, 64  ;;  %s1158_s28 = scalar_lea.hbm %s1623_s7, 128 }
 0x13c   : > { %p1155_p6 = scmp.ne.s32.totalorder %s1479_s19, %s1154_s30  ;;  %p1159_p10 = scmp.lt.u32.totalorder %s1479_s19, %s1623_s7 }
 0x13d   : > { %p1160_p11 = scmp.lt.u32.totalorder %s1158_s28, %s1154_s30  ;;  %p1162_p13 = scmp.lt.u32.totalorder %s1154_s30, %s1479_s19 }
 0x13e   : > { %p1156_p7 = pnand %p1155_p6, %p1384_p4 }
 0x13f   : > { %p1161_p12 = por %p1160_p11, %p1159_p10 }
 0x140   : > { %p1157_p9 = pneg %p1156_p7 }
 0x141   : > { %p1163_p0 = por %p1162_p13, %p1161_p12 }
 0x143   : > { %p1164_p1 = pnand %p1163_p0, %p1157_p9 }
 0x145   : > { %1167 = shalt.err (!%p1164_p1)
}
 0x146   : > { %1057 = dma.vmem_to_hbm [thread:$0]  (%p1384_p4), %s1481_s12, 64, %s1479_s19, %s737_s20   ;;  %v641_v63 = vmax.f32 %v639_v59, %v640_v62  ;;  %v637_v3 = vcvt.s32.f32 %v1459_v44  ;;  %v726_v21 = vsel %vm638_vm14, %v725_v61, 0.0 }
 0x147   : > { %s1640_s1 = sadd.s32 4294967295, %s1278_s18   ;;  %s1021_s12 = sshll.u32 %s1270_s16, 4 }
 0x148   : > { %v642_v0 = vrot.slane %v641_v63, 2  ;;  %s1514_s27 = sand.u32 1, %s1640_s1   ;;  %s451_s19 = scalar_lea.vmem [#allocation4], %s1466_s24 }
 0x149   : > { %s779_s20 = sshll.u32 %s451_s19, 4  ;;  %s1641_s22 = scalar_lea.vmem [#allocation6], %s1466_s24  ;;  %s1526_s20 = int_to_ptr.vmem [resolvable:$true] %s779_s20 }
 0x14a   : > { %v643_v1 = vmax.f32 %v641_v63, %v642_v0  ;;  %s793_s0 = sshll.u32 %s1641_s22, 4  ;;  %s1524_s28 = scalar_lea.hbm %s1624_s8, %s1021_s12  ;;  %s1536_s0 = int_to_ptr.vmem [resolvable:$true] %s793_s0 }
 0x14b   : > { %s1534_s11 = scalar_lea.hbm %s1625_s9, %s1021_s12  ;;  %s742_s1 = scalar_lea.sflag [#allocation5], %s1514_s27 }
 0x14c   : > { %v644_v2 = vrot.slane %v643_v1, 1  ;;  %s1168_s22 = scalar_lea.vmem %s1526_s20, 16  ;;  %s1285_s30 = smov [#allocation4]  }
 0x14d   : > { %p1169_p2 = scmp.ne.s32.totalorder %s1526_s20, %s1168_s22  ;;  %s1172_s2 = sshll.u32 %s1285_s30, 4  ;;  %s1173_s2 = int_to_ptr.vmem [resolvable:$false] %s1172_s2 }
 0x14e   : > { %v1507_v4 = vmax.f32 %v643_v1, %v644_v2  ;;  %s1174_s3 = scalar_lea.vmem %s1173_s2, 32  ;;  %p1175_p6 = scmp.lt.s32.totalorder %s1526_s20, %s1173_s2 }
 0x14f   : > { %p1170_p3 = pnand %p1169_p2, %p1384_p4  ;;  %p1176_p7 = scmp.lt.s32.totalorder %s1174_s3, %s1168_s22 }
 0x150   : > { %vm646_vm15 = vcmp.eq.f32.partialorder %v627_v56, %v1507_v4  ;;  %v707_v5 = vsub.f32 %v627_v56, %v1507_v4 }
 0x151   : > { %v647_v6 = vsel %vm646_vm15, %v637_v3, 4.0  ;;  %p1171_p5 = pneg %p1170_p3  ;;  %p1177_p9 = por %p1176_p7, %p1175_p6 }
 0x152   : > { %v708_v7 = vmul.f32 1.442695, %v707_v5  ;;  %v648_v8 = vsel %vm638_vm14, %v647_v6, inf }
 0x153   : > { %v649_v9 = vrot.slane %v648_v8, 4  ;;  %p1178_p10 = pnand %p1177_p9, %p1171_p5 }
 0x154   : > { %1136 = vpow2.f32 %v708_v7 }
 0x155   : > { %v650_v10 = vmin.f32 %v648_v8, %v649_v9 }
 0x157   : > { %v651_v11 = vrot.slane %v650_v10, 2 }
 0x159   : > { %v652_v12 = vmin.f32 %v650_v10, %v651_v11 }
 0x15b   : > { %v653_v13 = vrot.slane %v652_v12, 1 }
 0x15d   : > { %v654_v14 = vmin.f32 %v652_v12, %v653_v13 }
 0x15e   : > { %v1137_v15 = vpop.eup %1136 }
 0x15f   : > { %v710_v16 = vsel %vm638_vm14, %v1137_v15, 0.0  ;;  %v1055_v17 = vtrunc.f32 %v654_v14 }
 0x160   : > { %v711_v18 = vrot.slane %v710_v16, 4 }
 0x161   : > { %v1056_v19 = vcvt.f32.s32 %v1055_v17 }
 0x162   : > { %v712_v20 = vadd.f32 %v711_v18, %v710_v16 }
 0x163   : > { %v656_v22 = vsel %vm634_vm11, %v1056_v19, 4294967295 }
 0x164   : > { %v713_v23 = vrot.slane %v712_v20, 2  ;;  %657 = vst [vmem:[%s451_s19] sm:$0x1] %v656_v22 }
 0x165   : > { %1181 = shalt.err (!%p1178_p10)
}
 0x166   : > { %s1182_s12 = scalar_lea.hbm %s1524_s28, 16  ;;  %s1186_s24 = scalar_lea.hbm %s1624_s8, 32 }
 0x167   : > { %p1183_p11 = scmp.ne.s32.totalorder %s1524_s28, %s1182_s12  ;;  %p1187_p0 = scmp.lt.u32.totalorder %s1524_s28, %s1624_s8 }
 0x168   : > { %p1188_p1 = scmp.lt.u32.totalorder %s1186_s24, %s1182_s12  ;;  %p1190_p3 = scmp.lt.u32.totalorder %s1182_s12, %s1524_s28 }
 0x169   : > { %p1184_p12 = pnand %p1183_p11, %p1384_p4 }
 0x16a   : > { %p1189_p2 = por %p1188_p1, %p1187_p0 }
 0x16b   : > { %p1185_p13 = pneg %p1184_p12 }
 0x16c   : > { %p1191_p5 = por %p1190_p3, %p1189_p2 }
 0x16e   : > { %p1192_p6 = pnand %p1191_p5, %p1185_p13 }
 0x170   : > { %1195 = shalt.err (!%p1192_p6)
}
 0x171   : > { %1058 = dma.vmem_to_hbm [thread:$0]  (%p1384_p4), %s1526_s20, 16, %s1524_s28, %s742_s1   ;;  %v727_v24 = vrot.slane %v726_v21, 4  ;;  %v714_v25 = vadd.f32 %v713_v23, %v712_v20 }
 0x172   : > { %s1196_s3 = scalar_lea.vmem %s1536_s0, 16  ;;  %s1286_s22 = smov [#allocation6]  }
 0x173   : > { %p1197_p7 = scmp.ne.s32.totalorder %s1536_s0, %s1196_s3  ;;  %s1200_s12 = sshll.u32 %s1286_s22, 4  ;;  %s1201_s12 = int_to_ptr.vmem [resolvable:$false] %s1200_s12 }
 0x174   : > { %s1202_s19 = scalar_lea.vmem %s1201_s12, 32  ;;  %p1203_p11 = scmp.lt.s32.totalorder %s1536_s0, %s1201_s12 }
 0x175   : > { %p1198_p9 = pnand %p1197_p7, %p1384_p4  ;;  %p1204_p12 = scmp.lt.s32.totalorder %s1202_s19, %s1196_s3 }
 0x177   : > { %p1199_p10 = pneg %p1198_p9  ;;  %p1205_p13 = por %p1204_p12, %p1203_p11 }
 0x179   : > { %p1206_p0 = pnand %p1205_p13, %p1199_p10 }
 0x17b   : > { %1209 = shalt.err (!%p1206_p0)
}
 0x17c   : > { %s1210_s20 = scalar_lea.hbm %s1534_s11, 16  ;;  %s1214_s24 = scalar_lea.hbm %s1625_s9, 32 }
 0x17d   : > { %p1211_p1 = scmp.ne.s32.totalorder %s1534_s11, %s1210_s20  ;;  %p1215_p5 = scmp.lt.u32.totalorder %s1534_s11, %s1625_s9 }
 0x17e   : > { %p1216_p6 = scmp.lt.u32.totalorder %s1214_s24, %s1210_s20  ;;  %p1218_p9 = scmp.lt.u32.totalorder %s1210_s20, %s1534_s11 }
 0x17f   : > { %p1212_p2 = pnand %p1211_p1, %p1384_p4 }
 0x180   : > { %p1217_p7 = por %p1216_p6, %p1215_p5 }
 0x181   : > { %p1213_p3 = pneg %p1212_p2 }
 0x182   : > { %p1219_p10 = por %p1218_p9, %p1217_p7 }
 0x184   : > { %p1220_p11 = pnand %p1219_p10, %p1213_p3 }
 0x186   : > { %1223 = shalt.err (!%p1220_p11)
}
 0x187   : > { %1059 = dma.vmem_to_hbm [thread:$0]  (%p1384_p4), %s1536_s0, 16, %s1534_s11, %s742_s1   ;;  %v715_v26 = vrot.slane %v714_v25, 1  ;;  %v728_v27 = vadd.f32 %v727_v24, %v726_v21 }
 0x188   : > { %s499_s27 = scalar_lea.vmem %s1626_s10, %s1408_s29 }
 0x189   : > { %v716_v28 = vadd.f32 %v715_v26, %v714_v25  ;;  %v729_v29 = vrot.slane %v728_v27, 2 }
 0x18b   : > { %1138 = vlog2.f32 %v716_v28  ;;  %v730_v30 = vadd.f32 %v729_v29, %v728_v27 }
 0x18d   : > { %v731_v31 = vrot.slane %v730_v30, 1 }
 0x18f   : > { %v732_v35 = vadd.f32 %v731_v31, %v730_v30 }
 0x195   : > { %v1139_v32 = vpop.eup %1138 }
 0x196   : > { %v718_v33 = vmul.f32 0.6931472, %v1139_v32 }
 0x198   : > { %v719_v34 = vadd.f32 %v718_v33, %v1507_v4 }
 0x19a   : > { %v733_v36 = vsub.f32 %v719_v34, %v732_v35 }
 0x19c   : > { %v734_v37 = vsel %vm634_vm11, %v733_v36, 0.0 }
 0x19d   : > { %735 = vst [vmem:[%s499_s27] sm:$0x1] %v734_v37 }
 0x19e PF: > { %p1073_p4 = scmp.ge.s32.totalorder %s1278_s18, 2  ;;  %s808_s0 = sand.u32 1, %s1258_s13  }
 0x19f   : > { %s809_s11 = scalar_lea.sflag [#allocation3], %s808_s0 }
 0x1a0   : > { %p1064_p12 = pnand %p1073_p4, %p1393_p8 }
 0x1a2   : > { %1249 = dma.done.wait (!%p1064_p12), %s809_s11, 64  }
 0x1a3   : > { %1251 = vsyncadd (!%p1064_p12), %s809_s11, 4294967232  ;;  %s1642_s1 = sadd.s32 4294967294, %s1278_s18  }
 0x1a4   : > { %s817_s22 = sand.u32 1, %s1642_s1  }
 0x1a5   : > { %s818_s29 = scalar_lea.sflag [#allocation5], %s817_s22 }
 0x1a6   : > { %1253 = dma.done.wait (!%p1064_p12), %s818_s29, 32  }
 0x1a7   : > { %1255 = vsyncadd (!%p1064_p12), %s818_s29, 4294967264  ;;  %s27_s18 = sadd.s32 1, %s1278_s18   ;;  %s1643_s13 = smov %s1262_s14 }
 0x1a8   : > { %p24_p13 = scmp.ge.s32.totalorder %s27_s18, 4   ;;  %s1644_s14 = smov %s1266_s15 }
 0x1a9   : > { %s1645_s15 = smov %s1399_s26  ;;  %s1646_s16 = smov %s1274_s17 }
 0x1aa   : > { %s1647_s17 = smov %s1649_s21  ;;  %26 = sbr.rel (!%p24_p13) target bundleno = 11 (0xb), region = 139 }
 0x1b1   :  { %839 = vsyncpa [#allocation3], 1 }
 0x1b2   :  { %841 = vsyncpa [#allocation3 + $0x1], 1 }
 0x1b3   :  { %842 = vsyncpa [#allocation5], 1 }
 0x1b4   :  { %844 = vsyncpa [#allocation5 + $0x1], 1 }

</bundles_post_ra>
